<compile_context>
chip_gen: v7x
topology: tpu7x:2x2x1
jax: 0.10.0
libtpu: 0.0.40
codegen_flags: <defaults>
</compile_context>

<pallas_src>
import functools

import jax
import jax.numpy as jnp
from jax.experimental import pallas as pl
from jax.experimental.pallas import tpu as pltpu

EPS = 1e-5
MOMENTUM = 0.9
_VMEM_LIMIT_BYTES = 48 << 20   # < 64 MiB physical on v7x; ample headroom on v5e/v6e.


# ---------------------------------------------------------------------------
# Tiling helpers
# ---------------------------------------------------------------------------

def _sublane_multiple(dtype):
    itemsize = jnp.dtype(dtype).itemsize
    return {4: 8, 2: 16, 1: 32}.get(itemsize, 8)


def _block_budget_bytes():
    """Per-block budget: ~6 MiB (v6e/v7x sweet spot), ~4 MiB on v5e."""
    kind = ""
    try:
        kind = jax.devices()[0].device_kind.lower()
    except Exception:
        pass
    if "v5 lite" in kind or "v5lite" in kind or "v5e" in kind:
        return 4 << 20
    return 6 << 20


def _divisor_tile(dim, candidates):
    for cand in candidates:
        if 0 < cand <= dim and dim % cand == 0:
            return cand
    return dim  # full-dim blocks are always legal


def _pick_tiles_3d(N, C, S, dtype, budget):
    """Tiles for x laid out as (N, C, S)."""
    item = jnp.dtype(dtype).itemsize
    sub = _sublane_multiple(dtype)

    # Channel tile: dtype-aware sublane multiple dividing C, else full C.
    c_t = _divisor_tile(C, (16 * sub, 8 * sub, 4 * sub, 2 * sub, sub))
    # Guarantee >= 2 channel tiles when legal so the "parallel" channel axis of
    # the stats pass can split across both v7x TensorCores.
    if C // c_t < 2:
        for cand in range((C // 2) // sub * sub, sub - 1, -sub):
            if cand > 0 and C % cand == 0:
                c_t = cand
                break

    # Spatial tile: prefer the longest contiguous lane-dense run that fits.
    s_cands = [S] + [c for c in (16384, 8192, 4096, 2048, 1024, 512, 384, 256, 128)
                     if c < S]
    s_t = None
    for cand in s_cands:
        if S % cand != 0:
            continue
        if cand != S and cand % 128 != 0:
            continue
        if c_t * cand * item <= budget:
            s_t = cand
            break
    if s_t is None:
        s_t = _divisor_tile(S, (128,))

    # Batch tile: largest divisor of N keeping the block under budget.
    per_row = max(1, c_t * s_t * item)
    max_n = max(1, budget // per_row)
    n_t = 1
    for d in range(1, N + 1):
        if N % d == 0 and d <= max_n:
            n_t = d
    return n_t, c_t, s_t


def _pick_tiles_2d(N, C, dtype, budget):
    """Lane-dense tiles for 2D (N, C): channels on lanes, batch rows on sublanes."""
    item = jnp.dtype(dtype).itemsize
    c_t = None
    for cand in (8192, 4096, 2048, 1024, 512, 256, 128):
        if cand <= C and C % cand == 0 and 8 * cand * item <= budget:
            c_t = cand
            break
    if c_t is None:
        c_t = C                       # full-C block is always legal
    max_n = max(1, budget // max(1, c_t * item))
    n_t = None
    for d in range(min(N, max_n), 7, -1):
        if N % d == 0 and d % 8 == 0:
            n_t = d
            break
    if n_t is None:
        n_t = N                       # full-N block is always legal
    return n_t, c_t


# ---------------------------------------------------------------------------
# Kernels
# ---------------------------------------------------------------------------

def _bn_stats_kernel_3d(x_ref, g_ref, b_ref, mm_ref, mv_ref,
                        scale_ref, shift_ref, nmm_ref, nmv_ref,
                        sum_acc, sq_acc, *, count, eps, momentum):
    """Pass 1 for (N, C, S): lane-dense, element-wise-only accumulation.

    x_ref:                   (N_T, C_T, S_T)
    g/b/mm/mv_ref:           (C_T, 1)         resident across reduction axes
    scale/shift/nmm/nmv_ref: (C_T, 1)         written once at the last step
    sum_acc/sq_acc:          (C_T, S_T) f32   lane-dense accumulators
    """
    n_i = pl.program_id(1)
    s_i = pl.program_id(2)
    is_first = jnp.logical_and(n_i == 0, s_i == 0)
    is_last = jnp.logical_and(n_i == pl.num_programs(1) - 1,
                              s_i == pl.num_programs(2) - 1)

    @pl.when(is_first)
    def _():
        sum_acc[...] = jnp.zeros_like(sum_acc)
        sq_acc[...] = jnp.zeros_like(sq_acc)

    x = x_ref[...].astype(jnp.float32)           # (N_T, C_T, S_T)
    # Reduce only over the leading batch-tile axis (pure vreg-wise adds);
    # the cross-lane reduce happens once in the epilogue below.
    sum_acc[...] += jnp.sum(x, axis=0)           # (C_T, S_T)
    sq_acc[...] += jnp.sum(x * x, axis=0)        # (C_T, S_T)

    @pl.when(is_last)
    def _():
        inv_count = jnp.float32(1.0 / count)
        total = jnp.sum(sum_acc[...], axis=1, keepdims=True)      # (C_T, 1)
        total_sq = jnp.sum(sq_acc[...], axis=1, keepdims=True)    # (C_T, 1)
        mean = total * inv_count
        # Biased variance (matches the PyTorch reference); clamp guards tiny
        # negative E[x^2]-E[x]^2 cancellation in f32.
        var = jnp.maximum(total_sq * inv_count - mean * mean, 0.0)
        inv_std = jax.lax.rsqrt(var + eps)
        scale = g_ref[...] * inv_std
        scale_ref[...] = scale
        shift_ref[...] = b_ref[...] - mean * scale
        nmm_ref[...] = mm_ref[...] * momentum + mean * (1.0 - momentum)
        nmv_ref[...] = mv_ref[...] * momentum + var * (1.0 - momentum)


def _bn_norm_kernel_3d(x_ref, scale_ref, shift_ref, y_ref):
    """Pass 2 for (N, C, S): y = x * scale + shift in the x/y dtype."""
    scale = scale_ref[...].astype(y_ref.dtype)[None, :, :]   # (1, C_T, 1)
    shift = shift_ref[...].astype(y_ref.dtype)[None, :, :]
    y_ref[...] = x_ref[...] * scale + shift


def _bn_stats_kernel_2d(x_ref, g_ref, b_ref, mm_ref, mv_ref,
                        scale_ref, shift_ref, nmm_ref, nmv_ref,
                        sum_acc, sq_acc, *, count, eps, momentum, sub_rows):
    """Pass 1 for (N, C): channels on lanes, batch rows on sublanes.

    x_ref:                   (N_T, C_T)
    params / outputs:        (1, C_T)
    sum_acc/sq_acc:          (sub_rows, C_T) f32
    """
    n_i = pl.program_id(1)
    is_first = n_i == 0
    is_last = n_i == pl.num_programs(1) - 1

    @pl.when(is_first)
    def _():
        sum_acc[...] = jnp.zeros_like(sum_acc)
        sq_acc[...] = jnp.zeros_like(sq_acc)

    x = x_ref[...].astype(jnp.float32)           # (N_T, C_T)
    if sub_rows > 1:
        # Keep 8 sublanes live in the accumulator: the per-step reduce is
        # vreg-wise adds only; the sublane fold happens once at the end.
        xr = x.reshape(x.shape[0] // sub_rows, sub_rows, x.shape[1])
        sum_acc[...] += jnp.sum(xr, axis=0)
        sq_acc[...] += jnp.sum(xr * xr, axis=0)
    else:
        sum_acc[...] += jnp.sum(x, axis=0, keepdims=True)
        sq_acc[...] += jnp.sum(x * x, axis=0, keepdims=True)

    @pl.when(is_last)
    def _():
        inv_count = jnp.float32(1.0 / count)
        total = jnp.sum(sum_acc[...], axis=0, keepdims=True)      # (1, C_T)
        total_sq = jnp.sum(sq_acc[...], axis=0, keepdims=True)
        mean = total * inv_count
        var = jnp.maximum(total_sq * inv_count - mean * mean, 0.0)
        inv_std = jax.lax.rsqrt(var + eps)
        scale = g_ref[...] * inv_std
        scale_ref[...] = scale
        shift_ref[...] = b_ref[...] - mean * scale
        nmm_ref[...] = mm_ref[...] * momentum + mean * (1.0 - momentum)
        nmv_ref[...] = mv_ref[...] * momentum + var * (1.0 - momentum)


def _bn_norm_kernel_2d(x_ref, scale_ref, shift_ref, y_ref):
    scale = scale_ref[...].astype(y_ref.dtype)    # (1, C_T)
    shift = shift_ref[...].astype(y_ref.dtype)
    y_ref[...] = x_ref[...] * scale + shift


# ---------------------------------------------------------------------------
# pallas_call wrappers
# ---------------------------------------------------------------------------

def _normalize_3d(x3, scale, shift):
    N, C, S = x3.shape
    n_t, c_t, s_t = _pick_tiles_3d(N, C, S, x3.dtype, _block_budget_bytes())
    grid = (C // c_t, N // n_t, S // s_t)
    x_spec = pl.BlockSpec((n_t, c_t, s_t), lambda c, n, s: (n, c, s))
    vec_spec = pl.BlockSpec((c_t, 1), lambda c, n, s: (c, 0))
    return pl.pallas_call(
        _bn_norm_kernel_3d,
        out_shape=jax.ShapeDtypeStruct((N, C, S), x3.dtype),
        grid_spec=pltpu.PrefetchScalarGridSpec(
            num_scalar_prefetch=0,
            grid=grid,
            in_specs=[x_spec, vec_spec, vec_spec],
            out_specs=x_spec,
        ),
        compiler_params=pltpu.CompilerParams(
            dimension_semantics=("parallel", "parallel", "parallel"),
            vmem_limit_bytes=_VMEM_LIMIT_BYTES),
    )(x3, scale, shift)


def _bn_train_3d(x3, g, b, mm, mv):
    """x3: (N, C, S); g/b/mm/mv: (C, 1) f32. Returns (y3, new_mm, new_mv)."""
    N, C, S = x3.shape
    n_t, c_t, s_t = _pick_tiles_3d(N, C, S, x3.dtype, _block_budget_bytes())
    grid = (C // c_t, N // n_t, S // s_t)   # channel axis first, reductions last

    x_spec = pl.BlockSpec((n_t, c_t, s_t), lambda c, n, s: (n, c, s))
    vec_spec = pl.BlockSpec((c_t, 1), lambda c, n, s: (c, 0))

    stats_kernel = functools.partial(
        _bn_stats_kernel_3d, count=float(N * S), eps=EPS, momentum=MOMENTUM)

    scale, shift, new_mm, new_mv = pl.pallas_call(
        stats_kernel,
        out_shape=tuple(jax.ShapeDtypeStruct((C, 1), jnp.float32)
                        for _ in range(4)),
        grid_spec=pltpu.PrefetchScalarGridSpec(
            num_scalar_prefetch=0,
            grid=grid,
            in_specs=[x_spec, vec_spec, vec_spec, vec_spec, vec_spec],
            out_specs=(vec_spec, vec_spec, vec_spec, vec_spec),
            scratch_shapes=[pltpu.VMEM((c_t, s_t), jnp.float32),
                            pltpu.VMEM((c_t, s_t), jnp.float32)],
        ),
        compiler_params=pltpu.CompilerParams(
            dimension_semantics=("parallel", "arbitrary", "arbitrary"),
            vmem_limit_bytes=_VMEM_LIMIT_BYTES),
    )(x3, g, b, mm, mv)

    y3 = _normalize_3d(x3, scale, shift)
    return y3, new_mm, new_mv


def _normalize_2d(x2, scale, shift):
    N, C = x2.shape
    n_t, c_t = _pick_tiles_2d(N, C, x2.dtype, _block_budget_bytes())
    grid = (C // c_t, N // n_t)
    x_spec = pl.BlockSpec((n_t, c_t), lambda c, n: (n, c))
    vec_spec = pl.BlockSpec((1, c_t), lambda c, n: (0, c))
    return pl.pallas_call(
        _bn_norm_kernel_2d,
        out_shape=jax.ShapeDtypeStruct((N, C), x2.dtype),
        grid_spec=pltpu.PrefetchScalarGridSpec(
            num_scalar_prefetch=0,
            grid=grid,
            in_specs=[x_spec, vec_spec, vec_spec],
            out_specs=x_spec,
        ),
        compiler_params=pltpu.CompilerParams(
            dimension_semantics=("parallel", "parallel"),
            vmem_limit_bytes=_VMEM_LIMIT_BYTES),
    )(x2, scale, shift)


def _bn_train_2d(x2, g, b, mm, mv):
    """x2: (N, C); g/b/mm/mv: (1, C) f32. Returns (y2, new_mm, new_mv)."""
    N, C = x2.shape
    n_t, c_t = _pick_tiles_2d(N, C, x2.dtype, _block_budget_bytes())
    grid = (C // c_t, N // n_t)

    x_spec = pl.BlockSpec((n_t, c_t), lambda c, n: (n, c))
    vec_spec = pl.BlockSpec((1, c_t), lambda c, n: (0, c))

    sub_rows = 8 if (n_t % 8 == 0) else 1
    stats_kernel = functools.partial(
        _bn_stats_kernel_2d, count=float(N), eps=EPS, momentum=MOMENTUM,
        sub_rows=sub_rows)

    scale, shift, new_mm, new_mv = pl.pallas_call(
        stats_kernel,
        out_shape=tuple(jax.ShapeDtypeStruct((1, C), jnp.float32)
                        for _ in range(4)),
        grid_spec=pltpu.PrefetchScalarGridSpec(
            num_scalar_prefetch=0,
            grid=grid,
            in_specs=[x_spec, vec_spec, vec_spec, vec_spec, vec_spec],
            out_specs=(vec_spec, vec_spec, vec_spec, vec_spec),
            scratch_shapes=[pltpu.VMEM((sub_rows, c_t), jnp.float32),
                            pltpu.VMEM((sub_rows, c_t), jnp.float32)],
        ),
        compiler_params=pltpu.CompilerParams(
            dimension_semantics=("parallel", "arbitrary"),
            vmem_limit_bytes=_VMEM_LIMIT_BYTES),
    )(x2, g, b, mm, mv)

    y2 = _normalize_2d(x2, scale, shift)
    return y2, new_mm, new_mv


@functools.partial(jax.jit, static_argnames=("training",))
def batch_norm_forward(x, gamma, beta, moving_mean, moving_val, training=True):
    """BatchNorm forward matching the PyTorch `batch_norm` function.

    x: (N, C, H, W) or (N, C). gamma/beta/moving_*: (1, C, 1, 1) or (1, C).
    Returns (y, new_moving_mean, new_moving_val) with the same shapes.
    """
    assert x.ndim in (2, 4)
    if x.ndim == 4:
        N, C, H, W = x.shape
        x3 = x.reshape(N, C, H * W)          # free reshape, no transpose
        g = gamma.reshape(C, 1).astype(jnp.float32)
        b = beta.reshape(C, 1).astype(jnp.float32)
        mm = moving_mean.reshape(C, 1).astype(jnp.float32)
        mv = moving_val.reshape(C, 1).astype(jnp.float32)
        if training:
            y3, nmm, nmv = _bn_train_3d(x3, g, b, mm, mv)
        else:
            inv_std = jax.lax.rsqrt(mv + EPS)
            scale = g * inv_std
            shift = b - mm * scale
            y3 = _normalize_3d(x3, scale, shift)
            nmm, nmv = mm, mv
        return (y3.reshape(N, C, H, W),
                nmm.reshape(1, C, 1, 1).astype(moving_mean.dtype),
                nmv.reshape(1, C, 1, 1).astype(moving_val.dtype))
    else:
        N, C = x.shape
        g = gamma.reshape(1, C).astype(jnp.float32)
        b = beta.reshape(1, C).astype(jnp.float32)
        mm = moving_mean.reshape(1, C).astype(jnp.float32)
        mv = moving_val.reshape(1, C).astype(jnp.float32)
        if training:
            y2, nmm, nmv = _bn_train_2d(x, g, b, mm, mv)
        else:
            inv_std = jax.lax.rsqrt(mv + EPS)
            scale = g * inv_std
            shift = b - mm * scale
            y2 = _normalize_2d(x, scale, shift)
            nmm, nmv = mm, mv
        return (y2,
                nmm.reshape(1, C).astype(moving_mean.dtype),
                nmv.reshape(1, C).astype(moving_val.dtype))


# ---------------------------------------------------------------------------
# Pure-JAX reference (mirrors the PyTorch function)
# ---------------------------------------------------------------------------

def batch_norm_reference(x, gamma, beta, moving_mean, moving_val, training=True):
    if not training:
        x_hat = (x - moving_mean) / jnp.sqrt(moving_val + EPS)
        return gamma * x_hat + beta, moving_mean, moving_val
    if x.ndim == 2:
        mean = x.mean(axis=0)
        var = ((x - mean) ** 2).mean(axis=0)
    else:
        mean = x.mean(axis=(0, 2, 3), keepdims=True)
        var = ((x - mean) ** 2).mean(axis=(0, 2, 3), keepdims=True)
    x_hat = (x - mean) / jnp.sqrt(var + EPS)
    y = gamma * x_hat + beta
    new_mm = moving_mean * MOMENTUM + mean * (1.0 - MOMENTUM)
    new_mv = moving_val * MOMENTUM + var * (1.0 - MOMENTUM)
    return y, new_mm, new_mv


if __name__ == "__main__":
    key = jax.random.PRNGKey(0)

    # --- 4D case: BatchNorm(num_features=4, num_dims=4), training mode ---
    N, C, H, W = 2, 4, 16, 16
    x4 = jax.random.normal(key, (N, C, H, W), dtype=jnp.float32)
    gamma4 = jnp.ones((1, C, 1, 1), jnp.float32)
    beta4 = jnp.zeros((1, C, 1, 1), jnp.float32)
    mm4 = jnp.zeros((1, C, 1, 1), jnp.float32)
    mv4 = jnp.zeros((1, C, 1, 1), jnp.float32)

    y4, nmm4, nmv4 = batch_norm_forward(x4, gamma4, beta4, mm4, mv4)
    jax.block_until_ready((y4, nmm4, nmv4))
    y4_r, mm4_r, mv4_r = batch_norm_reference(x4, gamma4, beta4, mm4, mv4)
    assert jnp.allclose(y4, y4_r, atol=1e-5, rtol=1e-5)
    assert jnp.allclose(nmm4, mm4_r, atol=1e-5, rtol=1e-5)
    assert jnp.allclose(nmv4, mv4_r, atol=1e-5, rtol=1e-5)

    # --- 4D case, eval (inference) mode ---
    mm4_e = jnp.full((1, C, 1, 1), 0.25, jnp.float32)
    mv4_e = jnp.full((1, C, 1, 1), 1.5, jnp.float32)
    y4_e, mm4_o, mv4_o = batch_norm_forward(x4, gamma4, beta4, mm4_e, mv4_e,
                                            training=False)
    jax.block_until_ready((y4_e, mm4_o, mv4_o))
    y4_er, _, _ = batch_norm_reference(x4, gamma4, beta4, mm4_e, mv4_e,
                                       training=False)
    assert jnp.allclose(y4_e, y4_er, atol=1e-5, rtol=1e-5)
    assert jnp.allclose(mm4_o, mm4_e) and jnp.allclose(mv4_o, mv4_e)

    # --- 2D case: BatchNorm(num_features=4, num_dims=2), training mode ---
    N2, C2 = 8, 4
    x2 = jax.random.normal(jax.random.PRNGKey(1), (N2, C2), dtype=jnp.float32)
    gamma2 = jnp.ones((1, C2), jnp.float32)
    beta2 = jnp.zeros((1, C2), jnp.float32)
    mm2 = jnp.zeros((1, C2), jnp.float32)
    mv2 = jnp.zeros((1, C2), jnp.float32)

    y2, nmm2, nmv2 = batch_norm_forward(x2, gamma2, beta2, mm2, mv2)
    jax.block_until_ready((y2, nmm2, nmv2))
    y2_r, mm2_r, mv2_r = batch_norm_reference(x2, gamma2, beta2, mm2, mv2)
    assert jnp.allclose(y2, y2_r, atol=1e-5, rtol=1e-5)
    assert jnp.allclose(nmm2, mm2_r, atol=1e-5, rtol=1e-5)
    assert jnp.allclose(nmv2, mv2_r, atol=1e-5, rtol=1e-5)

    print("KERNEL_OK")
</pallas_src>

<mosaic_0001>
module attributes {stable_mosaic.version = 11 : i64} {
  func.func @_bn_norm_kernel_3d(%arg0: i32, %arg1: i32, %arg2: i32, %arg3: memref<2x4x256xf32, #tpu.memory_space<vmem>>, %arg4: memref<4x1xf32, #tpu.memory_space<vmem>>, %arg5: memref<4x1xf32, #tpu.memory_space<vmem>>, %arg6: memref<2x4x256xf32, #tpu.memory_space<vmem>>) attributes {dimension_semantics = [#tpu.dimension_semantics<parallel>, #tpu.dimension_semantics<parallel>, #tpu.dimension_semantics<parallel>], iteration_bounds = array<i64: 1, 1, 1>, scalar_prefetch = 0 : i64, scratch_operands = 0 : i64, tpu.core_type = #tpu.core_type<tc>, window_params = [{transform_indices = @transform_0, window_bounds = array<i64: 2, 4, 256>}, {transform_indices = @transform_1, window_bounds = array<i64: 4, 1>}, {transform_indices = @transform_2, window_bounds = array<i64: 4, 1>}, {transform_indices = @transform_3, window_bounds = array<i64: 2, 4, 256>}]} {
    %c0 = arith.constant 0 : index
    %c0_0 = arith.constant 0 : index
    %0 = vector.load %arg4[%c0, %c0_0] : memref<4x1xf32, #tpu.memory_space<vmem>>, vector<4x1xf32>
    %1 = vector.shape_cast %0 : vector<4x1xf32> to vector<1x4x1xf32>
    %c0_1 = arith.constant 0 : index
    %c0_2 = arith.constant 0 : index
    %2 = vector.load %arg5[%c0_1, %c0_2] : memref<4x1xf32, #tpu.memory_space<vmem>>, vector<4x1xf32>
    %3 = vector.shape_cast %2 : vector<4x1xf32> to vector<1x4x1xf32>
    %c0_3 = arith.constant 0 : index
    %c0_4 = arith.constant 0 : index
    %c0_5 = arith.constant 0 : index
    %4 = vector.load %arg3[%c0_3, %c0_4, %c0_5] : memref<2x4x256xf32, #tpu.memory_space<vmem>>, vector<2x4x256xf32>
    %5 = vector.broadcast %1 : vector<1x4x1xf32> to vector<2x4x256xf32>
    %6 = arith.mulf %4, %5 : vector<2x4x256xf32>
    %7 = vector.broadcast %3 : vector<1x4x1xf32> to vector<2x4x256xf32>
    %8 = arith.addf %6, %7 : vector<2x4x256xf32>
    %c0_6 = arith.constant 0 : index
    %c0_7 = arith.constant 0 : index
    %c0_8 = arith.constant 0 : index
    %9 = vector.load %arg6[%c0_6, %c0_7, %c0_8] : memref<2x4x256xf32, #tpu.memory_space<vmem>>, vector<2x4x256xf32>
    tpu.vector_store %arg6[%c0_6, %c0_7, %c0_8], %8 {strides = array<i32>} : memref<2x4x256xf32, #tpu.memory_space<vmem>>, vector<2x4x256xf32>,
    return
  }
  func.func @transform_0(%arg0: i32, %arg1: i32, %arg2: i32) -> (i32, i32, i32) {
    %c0_i32 = arith.constant 0 : i32
    return %arg1, %arg0, %arg2 : i32, i32, i32
  }
  func.func @transform_1(%arg0: i32, %arg1: i32, %arg2: i32) -> (i32, i32) {
    %c0_i32 = arith.constant 0 : i32
    %c0_i32_0 = arith.constant 0 : i32
    return %arg0, %c0_i32 : i32, i32
  }
  func.func @transform_2(%arg0: i32, %arg1: i32, %arg2: i32) -> (i32, i32) {
    %c0_i32 = arith.constant 0 : i32
    %c0_i32_0 = arith.constant 0 : i32
    return %arg0, %c0_i32 : i32, i32
  }
  func.func @transform_3(%arg0: i32, %arg1: i32, %arg2: i32) -> (i32, i32, i32) {
    %c0_i32 = arith.constant 0 : i32
    return %arg1, %arg0, %arg2 : i32, i32, i32
  }
}

module attributes {stable_mosaic.version = 11 : i64} {
  func.func @_bn_stats_kernel_3d(%arg0: i32, %arg1: i32, %arg2: i32, %arg3: memref<2x4x256xf32, #tpu.memory_space<vmem>>, %arg4: memref<4x1xf32, #tpu.memory_space<vmem>>, %arg5: memref<4x1xf32, #tpu.memory_space<vmem>>, %arg6: memref<4x1xf32, #tpu.memory_space<vmem>>, %arg7: memref<4x1xf32, #tpu.memory_space<vmem>>, %arg8: memref<4x1xf32, #tpu.memory_space<vmem>>, %arg9: memref<4x1xf32, #tpu.memory_space<vmem>>, %arg10: memref<4x1xf32, #tpu.memory_space<vmem>>, %arg11: memref<4x1xf32, #tpu.memory_space<vmem>>, %arg12: memref<4x256xf32, #tpu.memory_space<vmem>>, %arg13: memref<4x256xf32, #tpu.memory_space<vmem>>) attributes {dimension_semantics = [#tpu.dimension_semantics<parallel>, #tpu.dimension_semantics<arbitrary>, #tpu.dimension_semantics<arbitrary>], iteration_bounds = array<i64: 1, 1, 1>, scalar_prefetch = 0 : i64, scratch_operands = 2 : i64, tpu.core_type = #tpu.core_type<tc>, window_params = [{transform_indices = @transform_0, window_bounds = array<i64: 2, 4, 256>}, {transform_indices = @transform_1, window_bounds = array<i64: 4, 1>}, {transform_indices = @transform_2, window_bounds = array<i64: 4, 1>}, {transform_indices = @transform_3, window_bounds = array<i64: 4, 1>}, {transform_indices = @transform_4, window_bounds = array<i64: 4, 1>}, {transform_indices = @transform_5, window_bounds = array<i64: 4, 1>}, {transform_indices = @transform_6, window_bounds = array<i64: 4, 1>}, {transform_indices = @transform_7, window_bounds = array<i64: 4, 1>}, {transform_indices = @transform_8, window_bounds = array<i64: 4, 1>}]} {
    %c0_i32 = arith.constant 0 : i32
    %0 = arith.cmpi eq, %arg1, %c0_i32 : i32
    %c0_i32_0 = arith.constant 0 : i32
    %1 = arith.cmpi eq, %arg2, %c0_i32_0 : i32
    %2 = arith.andi %0, %1 : i1
    %c0_i32_1 = arith.constant 0 : i32
    %3 = arith.cmpi eq, %arg1, %c0_i32_1 : i32
    %c0_i32_2 = arith.constant 0 : i32
    %4 = arith.cmpi eq, %arg2, %c0_i32_2 : i32
    %5 = arith.andi %3, %4 : i1
    %6 = arith.extui %2 : i1 to i32
    %c0_i32_3 = arith.constant 0 : i32
    %7 = arith.cmpi ne, %6, %c0_i32_3 : i32
    scf.if %7 {
      %cst_16 = arith.constant 0.000000e+00 : f32
      %20 = vector.broadcast %cst_16 : f32 to vector<4x256xf32>
      %c0_17 = arith.constant 0 : index
      %c0_18 = arith.constant 0 : index
      %21 = vector.load %arg12[%c0_17, %c0_18] : memref<4x256xf32, #tpu.memory_space<vmem>>, vector<4x256xf32>
      tpu.vector_store %arg12[%c0_17, %c0_18], %20 {strides = array<i32>} : memref<4x256xf32, #tpu.memory_space<vmem>>, vector<4x256xf32>,
      %cst_19 = arith.constant 0.000000e+00 : f32
      %22 = vector.broadcast %cst_19 : f32 to vector<4x256xf32>
      %c0_20 = arith.constant 0 : index
      %c0_21 = arith.constant 0 : index
      %23 = vector.load %arg13[%c0_20, %c0_21] : memref<4x256xf32, #tpu.memory_space<vmem>>, vector<4x256xf32>
      tpu.vector_store %arg13[%c0_20, %c0_21], %22 {strides = array<i32>} : memref<4x256xf32, #tpu.memory_space<vmem>>, vector<4x256xf32>,
    } else {
    }
    %c0 = arith.constant 0 : index
    %c0_4 = arith.constant 0 : index
    %c0_5 = arith.constant 0 : index
    %8 = vector.load %arg3[%c0, %c0_4, %c0_5] : memref<2x4x256xf32, #tpu.memory_space<vmem>>, vector<2x4x256xf32>
    %c0_6 = arith.constant 0 : index
    %c0_7 = arith.constant 0 : index
    %9 = vector.load %arg12[%c0_6, %c0_7] : memref<4x256xf32, #tpu.memory_space<vmem>>, vector<4x256xf32>
    %cst = arith.constant dense<0.000000e+00> : vector<4x256xf32>
    %10 = vector.multi_reduction <add>, %8, %cst [0] : vector<2x4x256xf32> to vector<4x256xf32>
    %11 = arith.addf %9, %10 : vector<4x256xf32>
    %c0_8 = arith.constant 0 : index
    %c0_9 = arith.constant 0 : index
    %12 = vector.load %arg12[%c0_8, %c0_9] : memref<4x256xf32, #tpu.memory_space<vmem>>, vector<4x256xf32>
    tpu.vector_store %arg12[%c0_8, %c0_9], %11 {strides = array<i32>} : memref<4x256xf32, #tpu.memory_space<vmem>>, vector<4x256xf32>,
    %c0_10 = arith.constant 0 : index
    %c0_11 = arith.constant 0 : index
    %13 = vector.load %arg13[%c0_10, %c0_11] : memref<4x256xf32, #tpu.memory_space<vmem>>, vector<4x256xf32>
    %14 = arith.mulf %8, %8 : vector<2x4x256xf32>
    %cst_12 = arith.constant dense<0.000000e+00> : vector<4x256xf32>
    %15 = vector.multi_reduction <add>, %14, %cst_12 [0] : vector<2x4x256xf32> to vector<4x256xf32>
    %16 = arith.addf %13, %15 : vector<4x256xf32>
    %c0_13 = arith.constant 0 : index
    %c0_14 = arith.constant 0 : index
    %17 = vector.load %arg13[%c0_13, %c0_14] : memref<4x256xf32, #tpu.memory_space<vmem>>, vector<4x256xf32>
    tpu.vector_store %arg13[%c0_13, %c0_14], %16 {strides = array<i32>} : memref<4x256xf32, #tpu.memory_space<vmem>>, vector<4x256xf32>,
    %18 = arith.extui %5 : i1 to i32
    %c0_i32_15 = arith.constant 0 : i32
    %19 = arith.cmpi ne, %18, %c0_i32_15 : i32
    scf.if %19 {
      %c0_16 = arith.constant 0 : index
      %c0_17 = arith.constant 0 : index
      %20 = vector.load %arg12[%c0_16, %c0_17] : memref<4x256xf32, #tpu.memory_space<vmem>>, vector<4x256xf32>
      %cst_18 = arith.constant dense<0.000000e+00> : vector<4xf32>
      %21 = vector.multi_reduction <add>, %20, %cst_18 [1] : vector<4x256xf32> to vector<4xf32>
      %22 = vector.shape_cast %21 : vector<4xf32> to vector<4x1xf32>
      %c0_19 = arith.constant 0 : index
      %c0_20 = arith.constant 0 : index
      %23 = vector.load %arg13[%c0_19, %c0_20] : memref<4x256xf32, #tpu.memory_space<vmem>>, vector<4x256xf32>
      %cst_21 = arith.constant dense<0.000000e+00> : vector<4xf32>
      %24 = vector.multi_reduction <add>, %23, %cst_21 [1] : vector<4x256xf32> to vector<4xf32>
      %25 = vector.shape_cast %24 : vector<4xf32> to vector<4x1xf32>
      %cst_22 = arith.constant 0.001953125 : f32
      %26 = vector.broadcast %cst_22 : f32 to vector<4x1xf32>
      %27 = arith.mulf %22, %26 : vector<4x1xf32>
      %cst_23 = arith.constant 0.001953125 : f32
      %28 = vector.broadcast %cst_23 : f32 to vector<4x1xf32>
      %29 = arith.mulf %25, %28 : vector<4x1xf32>
      %30 = arith.mulf %27, %27 : vector<4x1xf32>
      %31 = arith.subf %29, %30 : vector<4x1xf32>
      %cst_24 = arith.constant 0.000000e+00 : f32
      %32 = vector.broadcast %cst_24 : f32 to vector<4x1xf32>
      %33 = arith.maximumf %31, %32 : vector<4x1xf32>
      %cst_25 = arith.constant 9.99999974E-6 : f32
      %34 = vector.broadcast %cst_25 : f32 to vector<4x1xf32>
      %35 = arith.addf %33, %34 : vector<4x1xf32>
      %36 = math.rsqrt %35 : vector<4x1xf32>
      %c0_26 = arith.constant 0 : index
      %c0_27 = arith.constant 0 : index
      %37 = vector.load %arg4[%c0_26, %c0_27] : memref<4x1xf32, #tpu.memory_space<vmem>>, vector<4x1xf32>
      %38 = arith.mulf %37, %36 : vector<4x1xf32>
      %c0_28 = arith.constant 0 : index
      %c0_29 = arith.constant 0 : index
      %39 = vector.load %arg8[%c0_28, %c0_29] : memref<4x1xf32, #tpu.memory_space<vmem>>, vector<4x1xf32>
      tpu.vector_store %arg8[%c0_28, %c0_29], %38 {strides = array<i32>} : memref<4x1xf32, #tpu.memory_space<vmem>>, vector<4x1xf32>,
      %c0_30 = arith.constant 0 : index
      %c0_31 = arith.constant 0 : index
      %40 = vector.load %arg5[%c0_30, %c0_31] : memref<4x1xf32, #tpu.memory_space<vmem>>, vector<4x1xf32>
      %41 = arith.mulf %27, %38 : vector<4x1xf32>
      %42 = arith.subf %40, %41 : vector<4x1xf32>
      %c0_32 = arith.constant 0 : index
      %c0_33 = arith.constant 0 : index
      %43 = vector.load %arg9[%c0_32, %c0_33] : memref<4x1xf32, #tpu.memory_space<vmem>>, vector<4x1xf32>
      tpu.vector_store %arg9[%c0_32, %c0_33], %42 {strides = array<i32>} : memref<4x1xf32, #tpu.memory_space<vmem>>, vector<4x1xf32>,
      %c0_34 = arith.constant 0 : index
      %c0_35 = arith.constant 0 : index
      %44 = vector.load %arg6[%c0_34, %c0_35] : memref<4x1xf32, #tpu.memory_space<vmem>>, vector<4x1xf32>
      %cst_36 = arith.constant 0.899999976 : f32
      %45 = vector.broadcast %cst_36 : f32 to vector<4x1xf32>
      %46 = arith.mulf %44, %45 : vector<4x1xf32>
      %cst_37 = arith.constant 1.000000e-01 : f32
      %47 = vector.broadcast %cst_37 : f32 to vector<4x1xf32>
      %48 = arith.mulf %27, %47 : vector<4x1xf32>
      %49 = arith.addf %46, %48 : vector<4x1xf32>
      %c0_38 = arith.constant 0 : index
      %c0_39 = arith.constant 0 : index
      %50 = vector.load %arg10[%c0_38, %c0_39] : memref<4x1xf32, #tpu.memory_space<vmem>>, vector<4x1xf32>
      tpu.vector_store %arg10[%c0_38, %c0_39], %49 {strides = array<i32>} : memref<4x1xf32, #tpu.memory_space<vmem>>, vector<4x1xf32>,
      %c0_40 = arith.constant 0 : index
      %c0_41 = arith.constant 0 : index
      %51 = vector.load %arg7[%c0_40, %c0_41] : memref<4x1xf32, #tpu.memory_space<vmem>>, vector<4x1xf32>
      %cst_42 = arith.constant 0.899999976 : f32
      %52 = vector.broadcast %cst_42 : f32 to vector<4x1xf32>
      %53 = arith.mulf %51, %52 : vector<4x1xf32>
      %cst_43 = arith.constant 1.000000e-01 : f32
      %54 = vector.broadcast %cst_43 : f32 to vector<4x1xf32>
      %55 = arith.mulf %33, %54 : vector<4x1xf32>
      %56 = arith.addf %53, %55 : vector<4x1xf32>
      %c0_44 = arith.constant 0 : index
      %c0_45 = arith.constant 0 : index
      %57 = vector.load %arg11[%c0_44, %c0_45] : memref<4x1xf32, #tpu.memory_space<vmem>>, vector<4x1xf32>
      tpu.vector_store %arg11[%c0_44, %c0_45], %56 {strides = array<i32>} : memref<4x1xf32, #tpu.memory_space<vmem>>, vector<4x1xf32>,
    } else {
    }
    return
  }
  func.func @transform_0(%arg0: i32, %arg1: i32, %arg2: i32) -> (i32, i32, i32) {
    %c0_i32 = arith.constant 0 : i32
    return %arg1, %arg0, %arg2 : i32, i32, i32
  }
  func.func @transform_1(%arg0: i32, %arg1: i32, %arg2: i32) -> (i32, i32) {
    %c0_i32 = arith.constant 0 : i32
    %c0_i32_0 = arith.constant 0 : i32
    return %arg0, %c0_i32 : i32, i32
  }
  func.func @transform_2(%arg0: i32, %arg1: i32, %arg2: i32) -> (i32, i32) {
    %c0_i32 = arith.constant 0 : i32
    %c0_i32_0 = arith.constant 0 : i32
    return %arg0, %c0_i32 : i32, i32
  }
  func.func @transform_3(%arg0: i32, %arg1: i32, %arg2: i32) -> (i32, i32) {
    %c0_i32 = arith.constant 0 : i32
    %c0_i32_0 = arith.constant 0 : i32
    return %arg0, %c0_i32 : i32, i32
  }
  func.func @transform_4(%arg0: i32, %arg1: i32, %arg2: i32) -> (i32, i32) {
    %c0_i32 = arith.constant 0 : i32
    %c0_i32_0 = arith.constant 0 : i32
    return %arg0, %c0_i32 : i32, i32
  }
  func.func @transform_5(%arg0: i32, %arg1: i32, %arg2: i32) -> (i32, i32) {
    %c0_i32 = arith.constant 0 : i32
    %c0_i32_0 = arith.constant 0 : i32
    return %arg0, %c0_i32 : i32, i32
  }
  func.func @transform_6(%arg0: i32, %arg1: i32, %arg2: i32) -> (i32, i32) {
    %c0_i32 = arith.constant 0 : i32
    %c0_i32_0 = arith.constant 0 : i32
    return %arg0, %c0_i32 : i32, i32
  }
  func.func @transform_7(%arg0: i32, %arg1: i32, %arg2: i32) -> (i32, i32) {
    %c0_i32 = arith.constant 0 : i32
    %c0_i32_0 = arith.constant 0 : i32
    return %arg0, %c0_i32 : i32, i32
  }
  func.func @transform_8(%arg0: i32, %arg1: i32, %arg2: i32) -> (i32, i32) {
    %c0_i32 = arith.constant 0 : i32
    %c0_i32_0 = arith.constant 0 : i32
    return %arg0, %c0_i32 : i32, i32
  }
}

</mosaic_0001>

<bundles_post_ra>
// kernel: batch_norm_forward.3
= control target key start
LH: loop header
LB: loop body
LE: loop exit
PB: predicated region body
PF: predicated region fallthrough
CT: control target
= control target key end

     0   :  { %v55_v0 = vmov 0   ;;  %v56_v3 = vmov 839922192   ;;  %v25_v5 = vlaneseq  ;;  %s95_s1 = inlined_call_operand.vmem [shape: f32[4,1], index: 1, kind: input, shape index: {}]   ;;  %s96_s2 = inlined_call_operand.vmem [shape: f32[4,1], index: 2, kind: input, shape index: {}]   ;;  %s97_s0 = inlined_call_operand.vmem [shape: f32[2,4,256], index: 0, kind: input, shape index: {}]   ;;  %s98_s3 = inlined_call_operand.vmem [shape: f32[2,4,256], index: 3, kind: output, shape index: {}]  }
   0x1   :  { %54 = vset.pattern.permute.xlu0 %v55_v0  ;;  %v14_v1 = vld [vmem:[%s95_s1] sm:$0xf]  ;;  %v23_v4 = vunpack.c.l.s4 %v56_v3  ;;  %v17_v12 = vld [vmem:[%s97_s0 + $0x8] sm:$0xff] }
   0x2   :  { %20 = vperm.xlu0 %54, %v14_v1   ;;  %v15_v2 = vld [vmem:[%s96_s2] sm:$0xf]  ;;  %v26_v7 = vshrl.u32 %v25_v5, 7 }
   0x3   :  { %v24_v6 = vunpack.c.0.s8 %v23_v4  ;;  %v16_v11 = vld [vmem:[%s97_s0] sm:$0xff] }
   0x5   :  { %v27_v8 = vsub.s32 %v24_v6, %v26_v7 }
   0x6   :  { %34 = vperm.xlu0 %54, %v15_v2  }
  0x81   :  { %v21_v9 = vpop.permute.xlu0 %20 }
  0x82   :  { %v28_v10 = vrot.slane %v21_v9, %v27_v8 }
  0x84   :  { %v30_v14 = vmul.f32 %v28_v10, %v16_v11  ;;  %v31_v15 = vmul.f32 %v28_v10, %v17_v12 }
  0x85   :  { %v35_v13 = vpop.permute.xlu0 %34 }
  0x86   :  { %v42_v16 = vrot.slane %v35_v13, %v27_v8 }
  0x88   :  { %v44_v17 = vadd.f32 %v42_v16, %v30_v14  ;;  %v45_v18 = vadd.f32 %v42_v16, %v31_v15 }
  0x8a   :  { %46 = vst [vmem:[%s98_s3] sm:$0xff] %v44_v17  ;;  %47 = vst [vmem:[%s98_s3 + $0x8] sm:$0xff] %v45_v18 }

// kernel: batch_norm_forward.2
= control target key start
LH: loop header
LB: loop body
LE: loop exit
PB: predicated region body
PF: predicated region fallthrough
CT: control target
= control target key end

     0   :  { %vm41_vm0 = vcmask 1043456   ;;  %vm104_vm1 = vcmask 3072   ;;  %s233_s0 = inlined_call_operand.vmem [shape: f32[2,4,256], index: 0, kind: input, shape index: {}]   ;;  %s234_s3 = inlined_call_operand.vmem [shape: f32[4,1], index: 3, kind: input, shape index: {}]   ;;  %s235_s4 = inlined_call_operand.vmem [shape: f32[4,1], index: 4, kind: input, shape index: {}]   ;;  %s236_s7 = inlined_call_operand.vmem [shape: f32[4,1], index: 7, kind: output, shape index: {2}]   ;;  %s237_s8 = inlined_call_operand.vmem [shape: f32[4,1], index: 8, kind: output, shape index: {3}]   ;;  %s238_s1 = inlined_call_operand.vmem [shape: f32[4,1], index: 1, kind: input, shape index: {}]   ;;  %s239_s2 = inlined_call_operand.vmem [shape: f32[4,1], index: 2, kind: input, shape index: {}]   ;;  %s240_s5 = inlined_call_operand.vmem [shape: f32[4,1], index: 5, kind: output, shape index: {0}]   ;;  %s241_s6 = inlined_call_operand.vmem [shape: f32[4,1], index: 6, kind: output, shape index: {1}]  }
   0x1   :  { %v32_v0 = vld [vmem:[%s233_s0] sm:$0xff]  ;;  %v33_v1 = vld [vmem:[%s233_s0 + $0x8] sm:$0xff] }
   0x2   :  { %v37_v2 = vcombine.high %v32_v0, %v32_v0  ;;  %v38_v3 = vcombine.high %v33_v1, %v33_v1  ;;  %v42_v4 = vsel %vm41_vm0, %v32_v0, 0.0  ;;  %v43_v5 = vsel %vm41_vm0, %v33_v1, 0.0  ;;  %v110_v30 = vld [vmem:[%s234_s3] sm:$0xf] }
   0x3   :  { %v44_v6 = vadd.f32 %v43_v5, %v42_v4  ;;  %v55_v7 = vmul.f32 %v32_v0, %v32_v0  ;;  %v56_v8 = vmul.f32 %v33_v1, %v33_v1  ;;  %v111_v32 = vmul.f32 0.9, %v110_v30  ;;  %v115_v39 = vld [vmem:[%s235_s4] sm:$0xf] }
   0x4   :  { %v45_v9 = vsel %vm41_vm0, %v37_v2, 0.0  ;;  %v46_v10 = vsel %vm41_vm0, %v38_v3, 0.0  ;;  %v116_v41 = vmul.f32 0.9, %v115_v39  ;;  %v102_v46 = vld [vmem:[%s238_s1] sm:$0xf] }
   0x5   :  { %v47_v11 = vadd.f32 %v46_v10, %v45_v9  ;;  %v59_v12 = vcombine.high %v55_v7, %v55_v7  ;;  %v60_v13 = vcombine.high %v56_v8, %v56_v8  ;;  %v63_v14 = vsel %vm41_vm0, %v55_v7, 0.0  ;;  %v106_v49 = vld [vmem:[%s239_s2] sm:$0xf] }
   0x6   :  { %v64_v15 = vsel %vm41_vm0, %v56_v8, 0.0 }
   0x7   :  { %v50_v16 = vcombine.low %v44_v6, %v47_v11  ;;  %v136_v17 = vcombine.low %v47_v11, %v47_v11  ;;  %v65_v18 = vadd.f32 %v64_v15, %v63_v14  ;;  %v66_v19 = vsel %vm41_vm0, %v59_v12, 0.0 }
   0x8   :  { %v67_v20 = vsel %vm41_vm0, %v60_v13, 0.0 }
   0x9   :  { %v81_v21 = vsel %vm41_vm0, %v50_v16, 0.0  ;;  %v82_v22 = vsel %vm41_vm0, %v136_v17, 0.0  ;;  %v68_v23 = vadd.f32 %v67_v20, %v66_v19 }
   0xa   :  { %v83_v24 = vadd.f32 %v82_v22, %v81_v21 }
   0xb   :  { %v71_v25 = vcombine.low %v65_v18, %v68_v23  ;;  %v137_v26 = vcombine.low %v68_v23, %v68_v23 }
   0xc   :  { %84 = vadd.xlane.f32.xlu0 %v83_v24 }
   0xd   :  { %v90_v27 = vsel %vm41_vm0, %v71_v25, 0.0  ;;  %v91_v28 = vsel %vm41_vm0, %v137_v26, 0.0 }
   0xe   :  { %v92_v29 = vadd.f32 %v91_v28, %v90_v27 }
  0x10   :  { %93 = vadd.xlane.f32.xlu0 %v92_v29 }
  0x99   :  { %v85_v31 = vpop.xlane.xlu0 %84 }
  0x9a   :  { %v95_v33 = vmul.f32 0.001953125, %v85_v31 }
  0x9c   :  { %v112_v34 = vmul.f32 0.1, %v95_v33  ;;  %v97_v37 = vmul.f32 %v95_v33, %v95_v33 }
  0x9d   :  { %v94_v35 = vpop.xlane.xlu0 %93 }
  0x9e   :  { %v113_v36 = vadd.f32 %v112_v34, %v111_v32  ;;  %v96_v38 = vmul.f32 0.001953125, %v94_v35 }
  0xa0   :  { %114 = vst.msk [vmem:[%s236_s7] sm:$0xf] %vm104_vm1, %v113_v36  ;;  %v98_v40 = vsub.f32 %v96_v38, %v97_v37 }
  0xa2   :  { %v99_v42 = vmax.f32 %v98_v40, 0.0 }
  0xa4   :  { %v100_v43 = vadd.f32 1e-05, %v99_v42  ;;  %v117_v44 = vmul.f32 0.1, %v99_v42 }
  0xa6   :  { %140 = vrsqrt.f32 %v100_v43  ;;  %v118_v45 = vadd.f32 %v117_v44, %v116_v41 }
  0xa8   :  { %119 = vst.msk [vmem:[%s237_s8] sm:$0xf] %vm104_vm1, %v118_v45 }
  0xb0   :  { %v141_v47 = vpop.eup %140 }
  0xb1   :  { %v103_v48 = vmul.f32 %v141_v47, %v102_v46 }
  0xb3   :  { %105 = vst.msk [vmem:[%s240_s5] sm:$0xf] %vm104_vm1, %v103_v48  ;;  %v107_v50 = vmul.f32 %v103_v48, %v95_v33 }
  0xb5   :  { %v108_v51 = vsub.f32 %v106_v49, %v107_v50 }
  0xb7   :  { %109 = vst.msk [vmem:[%s241_s6] sm:$0xf] %vm104_vm1, %v108_v51 }

</bundles_post_ra>
